<compile_context>
chip_gen: v7x
topology: tpu7x:2x2x1
jax: 0.10.0
libtpu: 0.0.40
codegen_flags: <defaults>
</compile_context>

<pallas_src>
import math
from functools import partial

import jax
import jax.numpy as jnp
from jax.experimental import pallas as pl
from jax.experimental.pallas import tpu as pltpu


# ----------------------------------------------------------------------------- helpers

_STACK_WEIGHT_ORDER = ("ln1_w", "ln1_b", "wq", "bq", "wk", "bk", "wv", "bv",
                       "wo", "bo", "ln2_w", "ln2_b", "fc1_w", "fc1_b", "fc2_w", "fc2_b")


def _vmem_limit_bytes():
    # Raise the scoped VMEM limit (defaults: 16 MiB v5e / 32 MiB v6e,v7x) but stay safely
    # under the smallest physical budget (64 MiB per TensorCore on v7x).
    try:
        cap = pltpu.get_tpu_info().vmem_capacity_bytes
    except Exception:
        cap = 64 * 1024 * 1024
    return int(min(max(cap, 32 * 1024 * 1024) - 4 * 1024 * 1024, 100 * 1024 * 1024))


def _compiler_params(dimension_semantics):
    return pltpu.CompilerParams(dimension_semantics=dimension_semantics,
                                vmem_limit_bytes=_vmem_limit_bytes())


def _pick_row_tile(n, candidates=(512, 256, 128, 64, 32, 16, 8)):
    for c in candidates:
        if n % c == 0:
            return c
    return n


def _round_up(n, m):
    return ((n + m - 1) // m) * m


def _ln(x, w, b, eps=1e-5):
    mean = jnp.mean(x, axis=-1, keepdims=True)
    var = jnp.mean(jnp.square(x - mean), axis=-1, keepdims=True)
    return (x - mean) * jax.lax.rsqrt(var + eps) * w + b


# ----------------------------------------------------------------------------- kernels

def patch_embed_kernel(p_ref, w_ref, o_ref):
    # p: (tm, C*ps*ps) bf16, w: (C*ps*ps, D) bf16 -> o: (tm, D) f32
    o_ref[...] = jnp.dot(p_ref[...], w_ref[...], preferred_element_type=jnp.float32)


def layernorm_kernel(x_ref, w_ref, b_ref, o_ref):
    o_ref[0] = _ln(x_ref[0], w_ref[...], b_ref[...])


def encoder_stack_kernel(x_ref, pre_w, pre_b,
                         ln1w, ln1b, wq, bq, wk, bk, wv, bv, wo, bo,
                         ln2w, ln2b, w1, b1, w2, b2,
                         o_ref, *, num_heads, t_actual):
    l = pl.program_id(1)

    # First layer step: fuse pre_layrnorm; afterwards the residual stream lives in the
    # revisited output block (resident in VMEM across the whole layer axis).
    @pl.when(l == 0)
    def _():
        o_ref[0] = _ln(x_ref[0], pre_w[...], pre_b[...])

    x = o_ref[0]                                    # (Tp, D) f32 residual stream
    Tp, D = x.shape
    hd = D // num_heads

    # ---- self-attention (pre-LN); 1/sqrt(hd) is folded into wq/bq at init ----
    h = _ln(x, ln1w[0], ln1b[0]).astype(jnp.bfloat16)
    q = jnp.dot(h, wq[0], preferred_element_type=jnp.float32) + bq[0]
    k = jnp.dot(h, wk[0], preferred_element_type=jnp.float32) + bk[0]
    v = jnp.dot(h, wv[0], preferred_element_type=jnp.float32) + bv[0]

    qh = jnp.transpose(q.reshape(Tp, num_heads, hd), (1, 0, 2)).astype(jnp.bfloat16)
    kh = jnp.transpose(k.reshape(Tp, num_heads, hd), (1, 0, 2)).astype(jnp.bfloat16)
    vh = jnp.transpose(v.reshape(Tp, num_heads, hd), (1, 0, 2)).astype(jnp.bfloat16)

    s = jnp.einsum("hqd,hkd->hqk", qh, kh,
                   preferred_element_type=jnp.float32)          # (H, Tp, Tp)
    if Tp > t_actual:                                           # mask padded keys
        key_ids = jax.lax.broadcasted_iota(jnp.int32, (1, 1, Tp), 2)
        s = jnp.where(key_ids < t_actual, s, -1e30)
    p = jax.nn.softmax(s, axis=-1).astype(jnp.bfloat16)
    ah = jnp.einsum("hqk,hkd->hqd", p, vh,
                    preferred_element_type=jnp.float32)         # (H, Tp, hd)
    attn = jnp.transpose(ah, (1, 0, 2)).reshape(Tp, D).astype(jnp.bfloat16)
    x = x + jnp.dot(attn, wo[0], preferred_element_type=jnp.float32) + bo[0]

    # ---- MLP (pre-LN, quick_gelu) ----
    h = _ln(x, ln2w[0], ln2b[0]).astype(jnp.bfloat16)
    h1 = jnp.dot(h, w1[0], preferred_element_type=jnp.float32) + b1[0]
    h1 = (h1 * jax.nn.sigmoid(1.702 * h1)).astype(jnp.bfloat16)     # quick_gelu
    h2 = jnp.dot(h1, w2[0], preferred_element_type=jnp.float32) + b2[0]
    o_ref[0] = x + h2


# ----------------------------------------------------------------------------- wrappers

def patch_embed_pallas(patches_bf16, w_t_bf16):
    BP, K = patches_bf16.shape
    D = w_t_bf16.shape[1]
    tm = _pick_row_tile(BP)
    return pl.pallas_call(
        patch_embed_kernel,
        out_shape=jax.ShapeDtypeStruct((BP, D), jnp.float32),
        grid=(BP // tm,),
        in_specs=[pl.BlockSpec((tm, K), lambda i: (i, 0)),
                  pl.BlockSpec((K, D), lambda i: (0, 0))],   # weight stays resident
        out_specs=pl.BlockSpec((tm, D), lambda i: (i, 0)),
        compiler_params=_compiler_params(("parallel",)),
    )(patches_bf16, w_t_bf16)


def layernorm_pallas(x, w, b):
    # Only used for the select_layer == embeddings edge case.
    B, T, D = x.shape
    return pl.pallas_call(
        layernorm_kernel,
        out_shape=jax.ShapeDtypeStruct((B, T, D), jnp.float32),
        grid=(B,),
        in_specs=[pl.BlockSpec((1, T, D), lambda i: (i, 0, 0)),
                  pl.BlockSpec((1, D), lambda i: (0, 0)),
                  pl.BlockSpec((1, D), lambda i: (0, 0))],
        out_specs=pl.BlockSpec((1, T, D), lambda i: (i, 0, 0)),
        compiler_params=_compiler_params(("parallel",)),
    )(x, w, b)


def encoder_stack_pallas(x, pre_w, pre_b, stacked, num_heads, t_actual):
    """Run `L` encoder layers in one pallas_call; activations stay in VMEM."""
    B, Tp, D = x.shape
    L = stacked["wq"].shape[0]
    weights = [stacked[k] for k in _STACK_WEIGHT_ORDER]

    def stacked_spec(arr):
        rest = arr.shape[1:]
        return pl.BlockSpec((1,) + rest,
                            lambda b, l, _n=len(rest): (l,) + (0,) * _n)

    in_specs = [pl.BlockSpec((1, Tp, D), lambda b, l: (b, 0, 0)),
                pl.BlockSpec(pre_w.shape, lambda b, l: (0, 0)),
                pl.BlockSpec(pre_b.shape, lambda b, l: (0, 0))]
    in_specs += [stacked_spec(w) for w in weights]

    return pl.pallas_call(
        partial(encoder_stack_kernel, num_heads=num_heads, t_actual=t_actual),
        out_shape=jax.ShapeDtypeStruct((B, Tp, D), jnp.float32),
        grid=(B, L),                       # layers innermost, batch parallel
        in_specs=in_specs,
        out_specs=pl.BlockSpec((1, Tp, D), lambda b, l: (b, 0, 0)),  # resident across l
        compiler_params=_compiler_params(("parallel", "arbitrary")),
    )(x, pre_w, pre_b, *weights)


# ----------------------------------------------------------------------------- model

def init_params(key, *, channels, patch_size, hidden, num_heads, intermediate,
                num_layers, num_positions):
    ks = jax.random.split(key, 4 + num_layers)
    D, I, ps, C = hidden, intermediate, patch_size, channels
    hd = D // num_heads
    scale = 1.0 / math.sqrt(hd)

    # Conv2d weight (D, C, ps, ps) -> transposed flat (C*ps*ps, D), stored bf16 for MXU.
    conv_w = 0.02 * jax.random.normal(ks[0], (D, C, ps, ps), jnp.float32)
    params = {
        "patch_size": ps,
        "patch_w_t": conv_w.reshape(D, C * ps * ps).T.astype(jnp.bfloat16),
        "class_embedding": 0.02 * jax.random.normal(ks[1], (D,), jnp.float32),
        "pos_embedding": 0.02 * jax.random.normal(ks[2], (num_positions, D), jnp.float32),
        "pre_ln_w": jnp.ones((1, D), jnp.float32),
        "pre_ln_b": jnp.zeros((1, D), jnp.float32),
    }

    def lin(k, n_in, n_out):
        # PyTorch nn.Linear weight is (out, in); store pre-transposed (in, out).
        return (0.02 * jax.random.normal(k, (n_out, n_in), jnp.float32)).T

    layers = []
    for l in range(num_layers):
        lk = jax.random.split(ks[4 + l], 6)
        layers.append({
            "ln1_w": jnp.ones((1, D), jnp.float32), "ln1_b": jnp.zeros((1, D), jnp.float32),
            # attention 1/sqrt(head_dim) scale folded into the q projection weight + bias
            "wq": (lin(lk[0], D, D) * scale).astype(jnp.bfloat16),
            "bq": jnp.zeros((1, D), jnp.float32) * scale,
            "wk": lin(lk[1], D, D).astype(jnp.bfloat16), "bk": jnp.zeros((1, D), jnp.float32),
            "wv": lin(lk[2], D, D).astype(jnp.bfloat16), "bv": jnp.zeros((1, D), jnp.float32),
            "wo": lin(lk[3], D, D).astype(jnp.bfloat16), "bo": jnp.zeros((1, D), jnp.float32),
            "ln2_w": jnp.ones((1, D), jnp.float32), "ln2_b": jnp.zeros((1, D), jnp.float32),
            "fc1_w": lin(lk[4], D, I).astype(jnp.bfloat16), "fc1_b": jnp.zeros((1, I), jnp.float32),
            "fc2_w": lin(lk[5], I, D).astype(jnp.bfloat16), "fc2_b": jnp.zeros((1, D), jnp.float32),
        })
    # Stack with a leading layer axis so the whole encoder runs in a single pallas_call.
    params["layers_stacked"] = {
        k: jnp.stack([layers[l][k] for l in range(num_layers)], axis=0)
        for k in _STACK_WEIGHT_ORDER
    }
    return params


def clip_vision_tower_forward(images, params, *, num_heads,
                              select_layer=-2, select_feature="patch"):
    """images: (B, C, H, W) NCHW float32 (PyTorch convention)."""
    B, C, H, W = images.shape
    ps = params["patch_size"]
    D = params["patch_w_t"].shape[1]
    Hn, Wn = H // ps, W // ps
    P = Hn * Wn
    T = P + 1

    num_layers = params["layers_stacked"]["wq"].shape[0]
    # HF hidden_states index: 0 = embeddings + pre_layrnorm, i = output of encoder layer i-1.
    hs_idx = select_layer if select_layer >= 0 else num_layers + 1 + select_layer
    assert 0 <= hs_idx <= num_layers
    # Layers past hs_idx are never computed (their outputs would be dead).

    # --- patch extraction (glue) + patch embedding matmul (Pallas, bf16 MXU) ---
    patches = images.reshape(B, C, Hn, ps, Wn, ps)
    patches = patches.transpose(0, 2, 4, 1, 3, 5).reshape(B * P, C * ps * ps)
    patch_embeds = patch_embed_pallas(patches.astype(jnp.bfloat16),
                                      params["patch_w_t"]).reshape(B, P, D)

    # --- class token + positional embedding (glue) ---
    cls = jnp.broadcast_to(params["class_embedding"][None, None, :], (B, 1, D))
    x = jnp.concatenate([cls, patch_embeds], axis=1)            # (B, T, D) f32
    x = x + params["pos_embedding"][None, :, :]

    if hs_idx == 0:
        feats = layernorm_pallas(x, params["pre_ln_w"], params["pre_ln_b"])
    else:
        # Pad the token dim to a sublane/lane friendly length; padded keys masked in-kernel.
        Tp = _round_up(T, 8) if T <= 128 else _round_up(T, 128)
        x = jnp.pad(x, ((0, 0), (0, Tp - T), (0, 0)))
        stacked = {k: v[:hs_idx] for k, v in params["layers_stacked"].items()}
        out = encoder_stack_pallas(x, params["pre_ln_w"], params["pre_ln_b"],
                                   stacked, num_heads, T)
        feats = out[:, :T]

    # --- feature_select ---
    if select_feature == "patch":
        feats = feats[:, 1:]
    elif select_feature == "cls_patch":
        pass
    else:
        raise ValueError(f"Unexpected select feature: {select_feature}")
    return feats.astype(images.dtype)


# ----------------------------------------------------------------------------- main

if __name__ == "__main__":
    key = jax.random.PRNGKey(0)
    kparams, kimg = jax.random.split(key)

    # Small CLIP-like config: 16x16 image, 8x8 patches -> 4 patches + CLS = 5 tokens.
    B, C, H, W = 2, 3, 16, 16
    patch_size, hidden, num_heads, intermediate, num_layers = 8, 32, 4, 128, 4
    num_positions = (H // patch_size) * (W // patch_size) + 1

    params = init_params(kparams, channels=C, patch_size=patch_size, hidden=hidden,
                         num_heads=num_heads, intermediate=intermediate,
                         num_layers=num_layers, num_positions=num_positions)

    images = jax.random.normal(kimg, (B, C, H, W), jnp.float32)

    feats = clip_vision_tower_forward(images, params, num_heads=num_heads,
                                      select_layer=-2, select_feature="patch")
    jax.block_until_ready(feats)

    expected = (B, (H // patch_size) * (W // patch_size), hidden)
    assert feats.shape == expected, (feats.shape, expected)
    assert feats.dtype == images.dtype
    assert bool(jnp.all(jnp.isfinite(feats)))
    print("KERNEL_OK")
</pallas_src>

<mosaic_0001>
module attributes {stable_mosaic.version = 11 : i64} {
  func.func @patch_embed_kernel(%arg0: i32, %arg1: memref<8x192xbf16, #tpu.memory_space<vmem>>, %arg2: memref<192x32xbf16, #tpu.memory_space<vmem>>, %arg3: memref<8x32xf32, #tpu.memory_space<vmem>>) attributes {dimension_semantics = [#tpu.dimension_semantics<parallel>], iteration_bounds = array<i64: 1>, scalar_prefetch = 0 : i64, scratch_operands = 0 : i64, tpu.core_type = #tpu.core_type<tc>, window_params = [{transform_indices = @transform_0, window_bounds = array<i64: 8, 192>}, {pipeline_mode = #tpu.pipeline_mode<synchronous>, transform_indices = @transform_1, window_bounds = array<i64: 192, 32>}, {transform_indices = @transform_2, window_bounds = array<i64: 8, 32>}]} {
    %c0 = arith.constant 0 : index
    %c0_0 = arith.constant 0 : index
    %0 = vector.load %arg1[%c0, %c0_0] : memref<8x192xbf16, #tpu.memory_space<vmem>>, vector<8x192xbf16>
    %c0_1 = arith.constant 0 : index
    %c0_2 = arith.constant 0 : index
    %1 = vector.load %arg2[%c0_1, %c0_2] : memref<192x32xbf16, #tpu.memory_space<vmem>>, vector<192x32xbf16>
    %cst = arith.constant dense<0.000000e+00> : vector<8x32xf32>
    %2 = tpu.matmul %0, %1, %cst {dimension_numbers = #tpu.dot_dimension_numbers<[1], [0], [0], [1], [0, 0, 1, 1], [], []>} : vector<8x192xbf16>, vector<192x32xbf16>, vector<8x32xf32> -> vector<8x32xf32>
    %c0_3 = arith.constant 0 : index
    %c0_4 = arith.constant 0 : index
    %3 = vector.load %arg3[%c0_3, %c0_4] : memref<8x32xf32, #tpu.memory_space<vmem>>, vector<8x32xf32>
    tpu.vector_store %arg3[%c0_3, %c0_4], %2 {strides = array<i32>} : memref<8x32xf32, #tpu.memory_space<vmem>>, vector<8x32xf32>,
    return
  }
  func.func @transform_0(%arg0: i32) -> (i32, i32) {
    %c0_i32 = arith.constant 0 : i32
    %c0_i32_0 = arith.constant 0 : i32
    return %arg0, %c0_i32 : i32, i32
  }
  func.func @transform_1(%arg0: i32) -> (i32, i32) {
    %c0_i32 = arith.constant 0 : i32
    %c0_i32_0 = arith.constant 0 : i32
    %c0_i32_1 = arith.constant 0 : i32
    return %c0_i32, %c0_i32_0 : i32, i32
  }
  func.func @transform_2(%arg0: i32) -> (i32, i32) {
    %c0_i32 = arith.constant 0 : i32
    %c0_i32_0 = arith.constant 0 : i32
    return %arg0, %c0_i32 : i32, i32
  }
}

</mosaic_0001>

<bundles_post_ra>
// kernel: tpu_custom_call.1
= control target key start
LH: loop header
LB: loop body
LE: loop exit
PB: predicated region body
PF: predicated region fallthrough
CT: control target
= control target key end

     0   :  { %v231_v1 = vmov 0   ;;  %vm116_vm0 = vcmask 523264   ;;  %s299_s0 = inlined_call_operand.vmem [shape: bf16[8,192], index: 0, kind: input, shape index: {}]   ;;  %s300_s1 = inlined_call_operand.vmem [shape: bf16[192,32], index: 1, kind: input, shape index: {}]   ;;  %s301_s2 = inlined_call_operand.hbm [shape: f32[8,32], index: 2, kind: output, shape index: {}]  }
   0x1   :  { %v193_v0 = vld [vmem:[%s300_s1] sm:$0xff]   ;;  %120 = vmatprep.subr.bf16.mxu0 %v231_v1  ;;  %v194_v2 = vld [vmem:[%s300_s1 + $0x8] sm:$0xff]   ;;  %v195_v3 = vld [vmem:[%s300_s1 + $0x10] sm:$0xff]  }
   0x2   :  { %121 = vmatpush1.bf16.msra.mxu0 %v193_v0  ;;  %v196_v4 = vld [vmem:[%s300_s1 + $0x18] sm:$0xff]   ;;  %v13_v5 = vld [vmem:[%s299_s0] sm:$0xff] }
   0x3   :  { %122 = vmatprep.subr.bf16.mxu0 %v231_v1 }
   0x6   :  { %123 = vmatpush1.bf16.msra.mxu0 %v194_v2 }
   0x7   :  { %124 = vmatprep.subr.bf16.mxu0 %v231_v1 }
   0xa   :  { %125 = vmatpush1.bf16.msra.mxu0 %v195_v3 }
   0xb   :  { %126 = vmatprep.subr.bf16.mxu0 %v231_v1 }
   0xc   :  { %7 = vsyncpa [#allocation3], 0  ;;  %v177_v6 = vcombine.high %v13_v5, %v13_v5  ;;  %v197_v7 = vld [vmem:[%s300_s1 + $0x20] sm:$0xff]   ;;  %v198_v8 = vld [vmem:[%s300_s1 + $0x28] sm:$0xff]   ;;  %v176_v15 = vcombine.low %v13_v5, %v13_v5  ;;  %s232_s6 = smov [#allocation2]   ;;  %vm160_vm1 = vcmask 261120  }
   0xd   :  { %v199_v9 = vld [vmem:[%s300_s1 + $0x30] sm:$0xff]   ;;  %v200_v10 = vld [vmem:[%s300_s1 + $0x38] sm:$0xff]   ;;  %v201_v11 = vld [vmem:[%s300_s1 + $0x40] sm:$0xff]   ;;  %s168_s7 = sshll.u32 %s232_s6, 4  ;;  %s169_s7 = int_to_ptr.vmem [resolvable:$true] %s168_s7 }
   0xe   :  { %127 = vmatpush1.bf16.msra.mxu0 %v196_v4  ;;  %190 = vmatprep.mubr.msk.bf16.mxu0 %vm116_vm0, %v177_v6  ;;  %v202_v12 = vld [vmem:[%s300_s1 + $0x48] sm:$0xff]   ;;  %v203_v13 = vld [vmem:[%s300_s1 + $0x50] sm:$0xff]   ;;  %v204_v14 = vld [vmem:[%s300_s1 + $0x58] sm:$0xff]   ;;  %s207_s8 = scalar_lea.vmem %s169_s7, 128  ;;  %p212_p1 = scmp.lt.s32.totalorder %s169_s7, %s169_s7 }
   0xf   :  { %128 = vmatprep.subr.bf16.mxu0 %v231_v1  ;;  %p208_p0 = scmp.ne.s32.totalorder %s169_s7, %s207_s8  ;;  %p213_p2 = scmp.lt.s32.totalorder %s207_s8, %s207_s8 }
  0x11   :  { %p214_p3 = por %p213_p2, %p212_p1 }
  0x12   :  { %129 = vmatpush1.bf16.msra.mxu0 %v197_v7 }
  0x13   :  { %130 = vmatprep.subr.bf16.mxu0 %v231_v1  ;;  %p215_p4 = pnand %p214_p3, %p208_p0 }
  0x16   :  { %131 = vmatpush1.bf16.msra.mxu0 %v198_v8 }
  0x17   :  { %132 = vmatprep.subr.bf16.mxu0 %v231_v1 }
  0x1a   :  { %133 = vmatpush1.bf16.msra.mxu0 %v199_v9 }
  0x1b   :  { %134 = vmatprep.subr.bf16.mxu0 %v231_v1 }
  0x1e   :  { %135 = vmatpush1.bf16.msra.mxu0 %v200_v10 }
  0x1f   :  { %136 = vmatprep.subr.bf16.mxu0 %v231_v1 }
  0x22   :  { %137 = vmatpush1.bf16.msra.mxu0 %v201_v11 }
  0x23   :  { %138 = vmatprep.subr.bf16.mxu0 %v231_v1 }
  0x26   :  { %139 = vmatpush1.bf16.msra.mxu0 %v202_v12 }
  0x27   :  { %140 = vmatprep.subr.bf16.mxu0 %v231_v1 }
  0x2a   :  { %141 = vmatpush1.bf16.msra.mxu0 %v203_v13 }
  0x2b   :  { %142 = vmatprep.subr.bf16.mxu0 %v231_v1 }
  0x2e   :  { %143 = vmatpush1.bf16.msra.mxu0 %v204_v14 }
  0x31   :  { %153 = vmatmul.mubr.bf16.vlgmr.msra.gmra.mrb[0].mxu0 %v176_v15 }
 0x104   :  { %v154_v16 = vpop.f32.mrb[0].mxu0 }
 0x105   :  { %161 = vst.msk [vmem:[#allocation2] sm:$0xff] %vm160_vm1, %v154_v16  ;;  %v156_v17 = vpop.f32.mrb[1].mxu0 }
 0x106   :  { %v157_v18 = vpop.f32.mrb[2].mxu0 }
 0x107   :  { %218 = shalt.err (!%p215_p4)
}
 0x108   :  { %s219_s10 = scalar_lea.hbm %s301_s2, 128 }
 0x109   :  { %p220_p5 = scmp.ne.s32.totalorder %s301_s2, %s219_s10  ;;  %p223_p6 = scmp.lt.u32.totalorder %s219_s10, %s301_s2 }
 0x10b   :  { %p225_p7 = pnand %p223_p6, %p220_p5 }
 0x10d   :  { %228 = shalt.err (!%p225_p7)
}
 0x10e   :  { %171 = dma.vmem_to_hbm [thread:$0]  %s169_s7, 128, %s301_s2, [#allocation3]   ;;  %v158_v19 = vpop.f32.mrb[3].mxu0 }
 0x10f   :  { %229 = dma.done.wait [#allocation3], 128  }
 0x110   :  { %230 = vsyncadd [#allocation3], 4294967168 }
 0x111   :  { %175 = vsyncpa [#allocation3], 1 }

</bundles_post_ra>
